<compile_context>
chip_gen: v5e
topology: v5e:2x2
jax: 0.10.0
libtpu: 0.0.40
codegen_flags: <defaults>
</compile_context>

<pallas_src>
import jax
import jax.numpy as jnp
from jax.experimental import pallas as pl
from jax.experimental.pallas import tpu as pltpu


def patch_embedding_forward(x, weight, bias, patch_size, *,
                            compute_dtype=None, out_dtype=None,
                            images_per_step=None):
    """Fused PatchEmbedding forward.

    x: (B, C, H, W) NCHW.
    weight: (D, E) == torch Linear weight (E, D) transposed, D = P*P*C ordered (p1, p2, c).
    bias: (E,).
    compute_dtype: MXU input dtype (bf16 recommended on v5e/v6e/v7x; f32 accumulation).
    out_dtype: output dtype (bf16 halves the output HBM stream for bf16 consumers).
    Returns (B, N, E).
    """
    B, C, H, W = x.shape
    P = patch_size
    assert H % P == 0 and W % P == 0, "image size must be divisible by patch_size"
    h, w = H // P, W // P
    N = h * w
    D = P * P * C
    E = weight.shape[-1]
    assert weight.shape == (D, E), (
        "weight must be the torch Linear weight transposed to (D, E) with the D axis "
        "ordered (p1, p2, c)")
    assert bias.shape == (E,)

    cdt = jnp.dtype(compute_dtype) if compute_dtype is not None else jnp.dtype(x.dtype)
    odt = jnp.dtype(out_dtype) if out_dtype is not None else jnp.dtype(x.dtype)

    # Reorder weight rows (p1, p2, c) -> (p2, c, p1): the ordering the in-kernel
    # relayout naturally produces.  Tiny (D, E) op, done once in XLA.
    w_r = (weight.reshape(P, P, C, E)
                 .transpose(1, 2, 0, 3)
                 .reshape(D, E)
                 .astype(cdt))
    b_r = bias.reshape(1, E).astype(jnp.float32)

    # Images per grid step: enough patch rows to feed the MXU (~256), capped so the
    # unrolled relayout stays small and the grid keeps >= 2 steps when B > 1
    # (v7x has 2 TensorCores; the "parallel" grid axis is sharded across them).
    if images_per_step is None:
        kb = max(1, min(32, 256 // max(N, 1)))
        if B > 1:
            kb = min(kb, pl.cdiv(B, 2))
    else:
        kb = max(1, images_per_step)
    kb = min(kb, B)
    nb = pl.cdiv(B, kb)          # ragged last block is masked by Pallas; no padding.
    R = kb * N                   # patch rows produced per grid step

    x_item = jnp.dtype(x.dtype).itemsize
    c_item = cdt.itemsize
    o_item = odt.itemsize

    def kernel(x_ref, w_ref, b_ref, o_ref, t_ref, pat_ref):
        # x_ref:   (kb, C, H, W)    streamed input images (double-buffered by Pallas)
        # w_ref:   (D, E)           resident weight, rows ordered (p2, c, p1)
        # b_ref:   (1, E) f32       resident bias
        # o_ref:   (kb, N, E)
        # t_ref:   (kb*N*P, C*P) f32 scratch: rows (b, hi, pw, p2), cols (c, p1)
        # pat_ref: (kb*N, D)        compute-dtype patch matrix, cols (p2, c, p1)
        for bi in range(kb):
            for c in range(C):
                for hi in range(h):
                    # (P, W) slab = one channel of one patch-row; a single 2-D
                    # transpose puts (pw, p2) on sublanes and p1 on lanes.
                    slab = x_ref[bi, c, hi * P:(hi + 1) * P, :].astype(jnp.float32)
                    r0 = (bi * h + hi) * W
                    t_ref[r0:r0 + W, c * P:(c + 1) * P] = slab.T
        # De-interleave p2 from the sublane index into the lane (column) index:
        # rows p2, p2+P, p2+2P, ... of t are exactly patch rows (b, hi, pw).
        for p2 in range(P):
            pat_ref[:, p2 * C * P:(p2 + 1) * C * P] = (
                t_ref[pl.ds(p2, R, P), :].astype(pat_ref.dtype))
        acc = jnp.dot(pat_ref[...], w_ref[...],
                      preferred_element_type=jnp.float32)
        res = acc + b_ref[...]
        for bi in range(kb):
            o_ref[bi] = res[bi * N:(bi + 1) * N, :].astype(o_ref.dtype)

    # Real VMEM footprint + headroom, capped below v7x's 64 MiB physical VMEM.
    footprint = (2 * kb * C * H * W * x_item      # double-buffered x blocks
                 + 2 * kb * N * E * o_item        # double-buffered out blocks
                 + 2 * D * E * c_item             # resident weight (2 pipeline bufs)
                 + 2 * E * 4                      # resident bias
                 + kb * N * P * C * P * 4         # t scratch (f32)
                 + kb * N * D * c_item)           # pat scratch
    vmem_limit = int(min(max(footprint + (8 << 20), 24 << 20), 48 << 20))

    out = pl.pallas_call(
        kernel,
        out_shape=jax.ShapeDtypeStruct((B, N, E), odt),
        grid_spec=pltpu.PrefetchScalarGridSpec(
            num_scalar_prefetch=0,
            grid=(nb,),
            in_specs=[
                pl.BlockSpec((kb, C, H, W), lambda i: (i, 0, 0, 0)),  # streamed images
                pl.BlockSpec((D, E), lambda i: (0, 0)),               # resident weight
                pl.BlockSpec((1, E), lambda i: (0, 0)),               # resident bias
            ],
            out_specs=pl.BlockSpec((kb, N, E), lambda i: (i, 0, 0)),
            scratch_shapes=[
                pltpu.VMEM((kb * N * P, C * P), jnp.float32),
                pltpu.VMEM((kb * N, D), cdt),
            ],
        ),
        compiler_params=pltpu.CompilerParams(
            dimension_semantics=("parallel",),     # image blocks are independent
            vmem_limit_bytes=vmem_limit,
        ),
    )(x, w_r, b_r)
    return out


def reference_forward(x, weight, bias, patch_size, compute_dtype=None):
    B, C, H, W = x.shape
    P = patch_size
    h, w = H // P, W // P
    xp = (x.reshape(B, C, h, P, w, P)
           .transpose(0, 2, 4, 3, 5, 1)
           .reshape(B, h * w, P * P * C))
    if compute_dtype is not None:
        xp = xp.astype(compute_dtype).astype(jnp.float32)
        weight = weight.astype(compute_dtype).astype(jnp.float32)
    return xp @ weight + bias


if __name__ == "__main__":
    # Shapes consistent with the module defaults: in_channels=3, patch_size=8,
    # emb_size=128, image 16x16 -> N=4 patches of dim D = 8*8*3 = 192.
    # (Note: E=128 exactly fills a v5e MXU; on v6e/v7x prefer E a multiple of 256
    #  when emb_size is a free parameter.)
    B, C, Himg, Wimg = 2, 3, 16, 16
    patch_size = 8
    emb_size = 128
    D = patch_size * patch_size * C
    N = (Himg // patch_size) * (Wimg // patch_size)

    key = jax.random.PRNGKey(0)
    kx, kw, kbias = jax.random.split(key, 3)

    x = jax.random.normal(kx, (B, C, Himg, Wimg), dtype=jnp.float32)
    # nn.Linear-style init; weight stored as (D, E) == torch weight (E, D) transposed.
    bound = 1.0 / (D ** 0.5)
    weight = jax.random.uniform(kw, (D, emb_size), jnp.float32, -bound, bound)
    bias = jax.random.uniform(kbias, (emb_size,), jnp.float32, -bound, bound)

    # f32 path (tight correctness check).
    out_f32 = jax.block_until_ready(
        patch_embedding_forward(x, weight, bias, patch_size))
    ref_f32 = reference_forward(x, weight, bias, patch_size)
    assert out_f32.shape == (B, N, emb_size)
    assert out_f32.dtype == jnp.float32
    assert jnp.allclose(out_f32, ref_f32, atol=1e-4, rtol=1e-4)

    # bf16-MXU / f32-accumulate path (recommended on v5e / v6e / v7x).
    out_bf16 = jax.block_until_ready(
        patch_embedding_forward(x, weight, bias, patch_size,
                                compute_dtype=jnp.bfloat16))
    ref_bf16 = reference_forward(x, weight, bias, patch_size,
                                 compute_dtype=jnp.bfloat16)
    assert out_bf16.dtype == jnp.float32
    assert jnp.allclose(out_bf16, ref_bf16, atol=2e-3, rtol=2e-3)

    # bf16 output stream (halves the (B, N, E) HBM write for bf16 consumers).
    out_bb = jax.block_until_ready(
        patch_embedding_forward(x, weight, bias, patch_size,
                                compute_dtype=jnp.bfloat16,
                                out_dtype=jnp.bfloat16))
    assert out_bb.dtype == jnp.bfloat16
    assert jnp.allclose(out_bb.astype(jnp.float32), ref_f32, atol=3e-2, rtol=3e-2)

    print("KERNEL_OK")
</pallas_src>

<mosaic_0001>
module attributes {stable_mosaic.version = 11 : i64} {
  func.func @kernel(%arg0: i32, %arg1: memref<1x3x16x16xf32, #tpu.memory_space<vmem>>, %arg2: memref<192x128xf32, #tpu.memory_space<vmem>>, %arg3: memref<1x128xf32, #tpu.memory_space<vmem>>, %arg4: memref<1x4x128xf32, #tpu.memory_space<vmem>>, %arg5: memref<32x24xf32, #tpu.memory_space<vmem>>, %arg6: memref<4x192xf32, #tpu.memory_space<vmem>>) attributes {dimension_semantics = [#tpu.dimension_semantics<parallel>], iteration_bounds = array<i64: 2>, scalar_prefetch = 0 : i64, scratch_operands = 2 : i64, tpu.core_type = #tpu.core_type<tc>, window_params = [{transform_indices = @transform_0, window_bounds = array<i64: 1, 3, 16, 16>}, {pipeline_mode = #tpu.pipeline_mode<synchronous>, transform_indices = @transform_1, window_bounds = array<i64: 192, 128>}, {pipeline_mode = #tpu.pipeline_mode<synchronous>, transform_indices = @transform_2, window_bounds = array<i64: 1, 128>}, {transform_indices = @transform_3, window_bounds = array<i64: 1, 4, 128>}]} {
    %c0 = arith.constant 0 : index
    %c0_0 = arith.constant 0 : index
    %c0_1 = arith.constant 0 : index
    %c0_2 = arith.constant 0 : index
    %0 = vector.load %arg1[%c0, %c0_0, %c0_1, %c0_2] : memref<1x3x16x16xf32, #tpu.memory_space<vmem>>, vector<1x1x8x16xf32>
    %1 = vector.shape_cast %0 : vector<1x1x8x16xf32> to vector<8x16xf32>
    %2 = tpu.transpose %1, [1, 0] : vector<8x16xf32> -> vector<16x8xf32>
    %c0_3 = arith.constant 0 : index
    %c0_4 = arith.constant 0 : index
    %3 = vector.load %arg5[%c0_3, %c0_4] : memref<32x24xf32, #tpu.memory_space<vmem>>, vector<16x8xf32>
    tpu.vector_store %arg5[%c0_3, %c0_4], %2 {strides = array<i32>} : memref<32x24xf32, #tpu.memory_space<vmem>>, vector<16x8xf32>,
    %c0_5 = arith.constant 0 : index
    %c0_6 = arith.constant 0 : index
    %c8 = arith.constant 8 : index
    %c0_7 = arith.constant 0 : index
    %4 = vector.load %arg1[%c0_5, %c0_6, %c8, %c0_7] : memref<1x3x16x16xf32, #tpu.memory_space<vmem>>, vector<1x1x8x16xf32>
    %5 = vector.shape_cast %4 : vector<1x1x8x16xf32> to vector<8x16xf32>
    %6 = tpu.transpose %5, [1, 0] : vector<8x16xf32> -> vector<16x8xf32>
    %c16 = arith.constant 16 : index
    %c0_8 = arith.constant 0 : index
    %7 = vector.load %arg5[%c16, %c0_8] : memref<32x24xf32, #tpu.memory_space<vmem>>, vector<16x8xf32>
    tpu.vector_store %arg5[%c16, %c0_8], %6 {strides = array<i32>} : memref<32x24xf32, #tpu.memory_space<vmem>>, vector<16x8xf32>,
    %c0_9 = arith.constant 0 : index
    %c1 = arith.constant 1 : index
    %c0_10 = arith.constant 0 : index
    %c0_11 = arith.constant 0 : index
    %8 = vector.load %arg1[%c0_9, %c1, %c0_10, %c0_11] : memref<1x3x16x16xf32, #tpu.memory_space<vmem>>, vector<1x1x8x16xf32>
    %9 = vector.shape_cast %8 : vector<1x1x8x16xf32> to vector<8x16xf32>
    %10 = tpu.transpose %9, [1, 0] : vector<8x16xf32> -> vector<16x8xf32>
    %c0_12 = arith.constant 0 : index
    %c8_13 = arith.constant 8 : index
    %11 = vector.load %arg5[%c0_12, %c8_13] : memref<32x24xf32, #tpu.memory_space<vmem>>, vector<16x8xf32>
    tpu.vector_store %arg5[%c0_12, %c8_13], %10 {strides = array<i32>} : memref<32x24xf32, #tpu.memory_space<vmem>>, vector<16x8xf32>,
    %c0_14 = arith.constant 0 : index
    %c1_15 = arith.constant 1 : index
    %c8_16 = arith.constant 8 : index
    %c0_17 = arith.constant 0 : index
    %12 = vector.load %arg1[%c0_14, %c1_15, %c8_16, %c0_17] : memref<1x3x16x16xf32, #tpu.memory_space<vmem>>, vector<1x1x8x16xf32>
    %13 = vector.shape_cast %12 : vector<1x1x8x16xf32> to vector<8x16xf32>
    %14 = tpu.transpose %13, [1, 0] : vector<8x16xf32> -> vector<16x8xf32>
    %c16_18 = arith.constant 16 : index
    %c8_19 = arith.constant 8 : index
    %15 = vector.load %arg5[%c16_18, %c8_19] : memref<32x24xf32, #tpu.memory_space<vmem>>, vector<16x8xf32>
    tpu.vector_store %arg5[%c16_18, %c8_19], %14 {strides = array<i32>} : memref<32x24xf32, #tpu.memory_space<vmem>>, vector<16x8xf32>,
    %c0_20 = arith.constant 0 : index
    %c2 = arith.constant 2 : index
    %c0_21 = arith.constant 0 : index
    %c0_22 = arith.constant 0 : index
    %16 = vector.load %arg1[%c0_20, %c2, %c0_21, %c0_22] : memref<1x3x16x16xf32, #tpu.memory_space<vmem>>, vector<1x1x8x16xf32>
    %17 = vector.shape_cast %16 : vector<1x1x8x16xf32> to vector<8x16xf32>
    %18 = tpu.transpose %17, [1, 0] : vector<8x16xf32> -> vector<16x8xf32>
    %c0_23 = arith.constant 0 : index
    %c16_24 = arith.constant 16 : index
    %19 = vector.load %arg5[%c0_23, %c16_24] : memref<32x24xf32, #tpu.memory_space<vmem>>, vector<16x8xf32>
    tpu.vector_store %arg5[%c0_23, %c16_24], %18 {strides = array<i32>} : memref<32x24xf32, #tpu.memory_space<vmem>>, vector<16x8xf32>,
    %c0_25 = arith.constant 0 : index
    %c2_26 = arith.constant 2 : index
    %c8_27 = arith.constant 8 : index
    %c0_28 = arith.constant 0 : index
    %20 = vector.load %arg1[%c0_25, %c2_26, %c8_27, %c0_28] : memref<1x3x16x16xf32, #tpu.memory_space<vmem>>, vector<1x1x8x16xf32>
    %21 = vector.shape_cast %20 : vector<1x1x8x16xf32> to vector<8x16xf32>
    %22 = tpu.transpose %21, [1, 0] : vector<8x16xf32> -> vector<16x8xf32>
    %c16_29 = arith.constant 16 : index
    %c16_30 = arith.constant 16 : index
    %23 = vector.load %arg5[%c16_29, %c16_30] : memref<32x24xf32, #tpu.memory_space<vmem>>, vector<16x8xf32>
    tpu.vector_store %arg5[%c16_29, %c16_30], %22 {strides = array<i32>} : memref<32x24xf32, #tpu.memory_space<vmem>>, vector<16x8xf32>,
    %c0_31 = arith.constant 0 : index
    %c0_32 = arith.constant 0 : index
    %24 = tpu.strided_load %arg5[%c0_31, %c0_32] {strides = array<i32: 8, 1>} : memref<32x24xf32, #tpu.memory_space<vmem>>, vector<4x24xf32>
    %c0_33 = arith.constant 0 : index
    %c0_34 = arith.constant 0 : index
    %25 = vector.load %arg6[%c0_33, %c0_34] : memref<4x192xf32, #tpu.memory_space<vmem>>, vector<4x24xf32>
    tpu.vector_store %arg6[%c0_33, %c0_34], %24 {strides = array<i32>} : memref<4x192xf32, #tpu.memory_space<vmem>>, vector<4x24xf32>,
    %c1_35 = arith.constant 1 : index
    %c0_36 = arith.constant 0 : index
    %26 = tpu.strided_load %arg5[%c1_35, %c0_36] {strides = array<i32: 8, 1>} : memref<32x24xf32, #tpu.memory_space<vmem>>, vector<4x24xf32>
    %c0_37 = arith.constant 0 : index
    %c24 = arith.constant 24 : index
    %27 = vector.load %arg6[%c0_37, %c24] : memref<4x192xf32, #tpu.memory_space<vmem>>, vector<4x24xf32>
    tpu.vector_store %arg6[%c0_37, %c24], %26 {strides = array<i32>} : memref<4x192xf32, #tpu.memory_space<vmem>>, vector<4x24xf32>,
    %c2_38 = arith.constant 2 : index
    %c0_39 = arith.constant 0 : index
    %28 = tpu.strided_load %arg5[%c2_38, %c0_39] {strides = array<i32: 8, 1>} : memref<32x24xf32, #tpu.memory_space<vmem>>, vector<4x24xf32>
    %c0_40 = arith.constant 0 : index
    %c48 = arith.constant 48 : index
    %29 = vector.load %arg6[%c0_40, %c48] : memref<4x192xf32, #tpu.memory_space<vmem>>, vector<4x24xf32>
    tpu.vector_store %arg6[%c0_40, %c48], %28 {strides = array<i32>} : memref<4x192xf32, #tpu.memory_space<vmem>>, vector<4x24xf32>,
    %c3 = arith.constant 3 : index
    %c0_41 = arith.constant 0 : index
    %30 = tpu.strided_load %arg5[%c3, %c0_41] {strides = array<i32: 8, 1>} : memref<32x24xf32, #tpu.memory_space<vmem>>, vector<4x24xf32>
    %c0_42 = arith.constant 0 : index
    %c72 = arith.constant 72 : index
    %31 = vector.load %arg6[%c0_42, %c72] : memref<4x192xf32, #tpu.memory_space<vmem>>, vector<4x24xf32>
    tpu.vector_store %arg6[%c0_42, %c72], %30 {strides = array<i32>} : memref<4x192xf32, #tpu.memory_space<vmem>>, vector<4x24xf32>,
    %c4 = arith.constant 4 : index
    %c0_43 = arith.constant 0 : index
    %32 = tpu.strided_load %arg5[%c4, %c0_43] {strides = array<i32: 8, 1>} : memref<32x24xf32, #tpu.memory_space<vmem>>, vector<4x24xf32>
    %c0_44 = arith.constant 0 : index
    %c96 = arith.constant 96 : index
    %33 = vector.load %arg6[%c0_44, %c96] : memref<4x192xf32, #tpu.memory_space<vmem>>, vector<4x24xf32>
    tpu.vector_store %arg6[%c0_44, %c96], %32 {strides = array<i32>} : memref<4x192xf32, #tpu.memory_space<vmem>>, vector<4x24xf32>,
    %c5 = arith.constant 5 : index
    %c0_45 = arith.constant 0 : index
    %34 = tpu.strided_load %arg5[%c5, %c0_45] {strides = array<i32: 8, 1>} : memref<32x24xf32, #tpu.memory_space<vmem>>, vector<4x24xf32>
    %c0_46 = arith.constant 0 : index
    %c120 = arith.constant 120 : index
    %35 = vector.load %arg6[%c0_46, %c120] : memref<4x192xf32, #tpu.memory_space<vmem>>, vector<4x24xf32>
    tpu.vector_store %arg6[%c0_46, %c120], %34 {strides = array<i32>} : memref<4x192xf32, #tpu.memory_space<vmem>>, vector<4x24xf32>,
    %c6 = arith.constant 6 : index
    %c0_47 = arith.constant 0 : index
    %36 = tpu.strided_load %arg5[%c6, %c0_47] {strides = array<i32: 8, 1>} : memref<32x24xf32, #tpu.memory_space<vmem>>, vector<4x24xf32>
    %c0_48 = arith.constant 0 : index
    %c144 = arith.constant 144 : index
    %37 = vector.load %arg6[%c0_48, %c144] : memref<4x192xf32, #tpu.memory_space<vmem>>, vector<4x24xf32>
    tpu.vector_store %arg6[%c0_48, %c144], %36 {strides = array<i32>} : memref<4x192xf32, #tpu.memory_space<vmem>>, vector<4x24xf32>,
    %c7 = arith.constant 7 : index
    %c0_49 = arith.constant 0 : index
    %38 = tpu.strided_load %arg5[%c7, %c0_49] {strides = array<i32: 8, 1>} : memref<32x24xf32, #tpu.memory_space<vmem>>, vector<4x24xf32>
    %c0_50 = arith.constant 0 : index
    %c168 = arith.constant 168 : index
    %39 = vector.load %arg6[%c0_50, %c168] : memref<4x192xf32, #tpu.memory_space<vmem>>, vector<4x24xf32>
    tpu.vector_store %arg6[%c0_50, %c168], %38 {strides = array<i32>} : memref<4x192xf32, #tpu.memory_space<vmem>>, vector<4x24xf32>,
    %c0_51 = arith.constant 0 : index
    %c0_52 = arith.constant 0 : index
    %40 = vector.load %arg6[%c0_51, %c0_52] : memref<4x192xf32, #tpu.memory_space<vmem>>, vector<4x192xf32>
    %c0_53 = arith.constant 0 : index
    %c0_54 = arith.constant 0 : index
    %41 = vector.load %arg2[%c0_53, %c0_54] : memref<192x128xf32, #tpu.memory_space<vmem>>, vector<192x128xf32>
    %cst = arith.constant dense<0.000000e+00> : vector<4x128xf32>
    %42 = tpu.matmul %40, %41, %cst {dimension_numbers = #tpu.dot_dimension_numbers<[1], [0], [0], [1], [0, 0, 1, 1], [], []>} : vector<4x192xf32>, vector<192x128xf32>, vector<4x128xf32> -> vector<4x128xf32>
    %c0_55 = arith.constant 0 : index
    %c0_56 = arith.constant 0 : index
    %43 = vector.load %arg3[%c0_55, %c0_56] : memref<1x128xf32, #tpu.memory_space<vmem>>, vector<1x128xf32>
    %44 = vector.broadcast %43 : vector<1x128xf32> to vector<4x128xf32>
    %45 = arith.addf %42, %44 : vector<4x128xf32>
    %c0_57 = arith.constant 0 : index
    %c0_58 = arith.constant 0 : index
    %c0_59 = arith.constant 0 : index
    %46 = vector.load %arg4[%c0_57, %c0_58, %c0_59] : memref<1x4x128xf32, #tpu.memory_space<vmem>>, vector<1x4x128xf32>
    %47 = vector.shape_cast %46 : vector<1x4x128xf32> to vector<4x128xf32>
    %48 = vector.shape_cast %45 : vector<4x128xf32> to vector<1x4x128xf32>
    tpu.vector_store %arg4[%c0_57, %c0_58, %c0_59], %48 {strides = array<i32>} : memref<1x4x128xf32, #tpu.memory_space<vmem>>, vector<1x4x128xf32>,
    return
  }
  func.func @transform_0(%arg0: i32) -> (i32, i32, i32, i32) {
    %c0_i32 = arith.constant 0 : i32
    %c0_i32_0 = arith.constant 0 : i32
    %c0_i32_1 = arith.constant 0 : i32
    %c0_i32_2 = arith.constant 0 : i32
    return %arg0, %c0_i32, %c0_i32_0, %c0_i32_1 : i32, i32, i32, i32
  }
  func.func @transform_1(%arg0: i32) -> (i32, i32) {
    %c0_i32 = arith.constant 0 : i32
    %c0_i32_0 = arith.constant 0 : i32
    %c0_i32_1 = arith.constant 0 : i32
    return %c0_i32, %c0_i32_0 : i32, i32
  }
  func.func @transform_2(%arg0: i32) -> (i32, i32) {
    %c0_i32 = arith.constant 0 : i32
    %c0_i32_0 = arith.constant 0 : i32
    %c0_i32_1 = arith.constant 0 : i32
    return %c0_i32, %c0_i32_0 : i32, i32
  }
  func.func @transform_3(%arg0: i32) -> (i32, i32, i32) {
    %c0_i32 = arith.constant 0 : i32
    %c0_i32_0 = arith.constant 0 : i32
    %c0_i32_1 = arith.constant 0 : i32
    return %arg0, %c0_i32, %c0_i32_0 : i32, i32, i32
  }
}

</mosaic_0001>

<bundles_post_ra>
// kernel: tpu_custom_call.1
= control target key start
LH: loop header
LB: loop body
LE: loop exit
PB: predicated region body
PF: predicated region fallthrough
CT: control target
= control target key end

     0   :  { %8 = vsyncpa [#allocation5], 0  ;;  %s1118_s0 = inlined_call_operand.hbm [shape: f32[2,3,16,16], index: 0, kind: input, shape index: {}]   ;;  %s1119_s1 = inlined_call_operand.hbm [shape: f32[192,128], index: 1, kind: input, shape index: {}]   ;;  %s1120_s2 = inlined_call_operand.vmem [shape: f32[1,128], index: 2, kind: input, shape index: {}]   ;;  %s1121_s3 = inlined_call_operand.hbm [shape: f32[2,4,128], index: 3, kind: output, shape index: {}]  }
   0x1   :  { %10 = vsyncpa [#allocation5 + $0x1], 0 }
   0x2   :  { %11 = vsyncpa [#allocation8], 0 }
   0x3   :  { %12 = vsyncpa [#allocation6], 0 }
   0x4   :  { %14 = vsyncpa [#allocation6 + $0x1], 0  ;;  %s945_s12 = smov 0   ;;  %s947_s13 = smov 0  }
   0x5   :  { %s949_s14 = smov 0   ;;  %s951_s15 = smov 0  }
   0x6 LB: > { %s966_s16 = sadd.s32 4294967295, %s912_s15   ;;  %s693_s17 = sadd.s32 4294967294, %s912_s15   ;;  %s912_s15 = sphi %s951_s15, %s1133_s15   ;;  %s908_s14 = sphi %s949_s14, %s1132_s14   ;;  %s904_s13 = sphi %s947_s13, %s1131_s13   ;;  %s900_s12 = sphi %s945_s12, %s1130_s12  }
   0x7   : > { %p40_p0 = scmp.ne.s32.totalorder %s904_s13, %s900_s12  ;;  %p41_p1 = scmp.eq.s32.totalorder %s966_s16, 0 }
   0x8   : > { %p106_p2 = scmp.eq.s32.totalorder %s966_s16, 1  ;;  %p112_p3 = scmp.eq.s32.totalorder %s693_s17, 1 }
   0x9   : > { %p975_p4 = por %p41_p1, %p40_p0  ;;  %p694_p5 = scmp.ge.s32.totalorder %s912_s15, 1 }
   0xa   : > { %p980_p6 = por %p112_p3, %p40_p0  ;;  %p119_p7 = scmp.lt.s32.totalorder %s912_s15, 3 }
   0xb   : > { %s130_s22 = sshll.u32 %s1119_s1, 4  ;;  %s914_s24 = smov [#allocation7]   ;;  %s131_s22 = int_to_ptr.hbm [resolvable:$true] %s130_s22 }
   0xc   : > { %p988_p8 = pnand %p694_p5, %p119_p7  ;;  %s132_s25 = sshll.u32 %s914_s24, 4  ;;  %s133_s25 = int_to_ptr.vmem [resolvable:$true] %s132_s25 }
   0xd   : > { %s998_s26 = sadd.s32 1, %s912_s15   ;;  %s1122_s27 = smov 128  }
   0xe   : > { %p721_p9 = pneg %p988_p8  ;;  %s916_s28 = smov 8  }
   0xf   : > { %s24_s29 = ssub.s32 %s912_s15, %s998_s26  ;;  %s27_s30 = sadd.s32 1, %s908_s14 }
  0x10   : > { %p722_p10 = pnand %p721_p9, %p41_p1  ;;  %p25_p12 = scmp.eq.s32.totalorder %s24_s29, 0 }
  0x11   : > { %p34_p13 = scmp.ne.s32.totalorder %s908_s14, %s904_s13  ;;  %p35_p0 = scmp.eq.s32.totalorder %s912_s15, 0 }
  0x12   : > { %724 = dma.hbm_to_vmem [thread:$0]  (!%p722_p10), %s131_s22, 3072, %s133_s25, [#allocation8], %s1122_s27, %s1122_s27, %s916_s28  }
  0x13   : > { %p734_p3 = scmp.lt.s32.totalorder %s912_s15, 2  ;;  %p36_p5 = por %p35_p0, %p34_p13 }
  0x14   : > { %s1011_s4 = scalar_select %p25_p12, %s908_s14, %s27_s30  }
  0x15   : > { %p1015_p7 = por %p106_p2, %p34_p13  ;;  %s149_s6 = sand.u32 1, %s908_s14  }
  0x16   : > { %s711_s7 = smul.u32 48, %s912_s15  ;;  %p1024_p9 = pnand %p734_p3, %p36_p5 }
  0x17   : > { %s710_s8 = smul.u32 48, %s149_s6  ;;  %s150_s24 = scalar_lea.sflag [#allocation5], %s149_s6 }
  0x18   : > { %s158_s11 = scalar_lea.hbm %s1118_s0, %s711_s7  ;;  %p816_p10 = pneg %p1024_p9 }
  0x19   : > { %s159_s20 = sshll.u32 %s158_s11, 4  ;;  %s153_s21 = scalar_lea.vmem [#allocation4], %s710_s8  ;;  %s160_s20 = int_to_ptr.hbm [resolvable:$true] %s159_s20 }
  0x1a   : > { %s161_s22 = sshll.u32 %s153_s21, 4  ;;  %s812_s25 = sshra.s32 %s160_s20, 4  ;;  %s162_s22 = int_to_ptr.vmem [resolvable:$true] %s161_s22  ;;  %s813_s25 = int_to_ptr.hbm [resolvable:$true] %s812_s25 }
  0x1b   : > { %s814_s29 = scalar_lea.hbm %s813_s25, 48  ;;  %s819_s9 = scalar_lea.hbm %s1118_s0, 96 }
  0x1c   : > { %p815_p2 = scmp.ne.s32.totalorder %s813_s25, %s814_s29  ;;  %p820_p0 = scmp.lt.s32.totalorder %s813_s25, %s1118_s0 }
  0x1d   : > { %p821_p3 = scmp.lt.s32.totalorder %s819_s9, %s814_s29 }
  0x1e   : > { %p817_p12 = pnand %p816_p10, %p815_p2 }
  0x1f   : > { %p822_p5 = por %p821_p3, %p820_p0 }
  0x20   : > { %p818_p13 = pneg %p817_p12 }
  0x22   : > { %p823_p11 = pnand %p822_p5, %p818_p13 }
  0x24   : > { %826 = shalt.err (!%p823_p11)
}
  0x25   : > { %s1128_s6 = smov 128   ;;  %173 = sbr.rel (%p988_p8) target bundleno = 775 (0x307), region = 32 }
  0x26   : > { %728 = dma.hbm_to_vmem [thread:$0]  (!%p1024_p9), %s160_s20, 768, %s162_s22, %s150_s24, %s1128_s6, %s1128_s6, %s916_s28  }
  0x27   : > { %s1044_s8 = sand.u32 (!%p988_p8), 1, %s904_s13  }
  0x28   : > { %s712_s27 = smul.u32 (!%p988_p8), 48, %s1044_s8  ;;  %s176_s11 = scalar_lea.sflag (!%p988_p8), [#allocation5], %s1044_s8 }
  0x2a   : > { %s1048_s21 = scalar_lea.vmem [#allocation4], %s712_s27 }
  0x2b   : > { %887 = dma.done.wait (%p975_p4), %s176_s11, 768  }
  0x2c   : > { %889 = vsyncadd (%p975_p4), %s176_s11, 4294966528 }
  0x2d   : > { %891 = dma.done.wait (%p41_p1), [#allocation8], 3072  }
  0x2e   : > { %893 = vsyncadd (%p41_p1), [#allocation8], 4294964224  ;;  %v701_v0 = vld [vmem:[%s1048_s21 + $0x10] sm:$0xff]  ;;  %v703_v1 = vld [vmem:[%s1048_s21 + $0x20] sm:$0xff]  ;;  %s917_s18 = smov 8   ;;  %s918_s23 = smov 16  }
  0x2f   : > { %281 = vxpose.xlu0.b32.start.end [1/1] (short) (narrow) %v701_v0, 16  ;;  %369 = vxpose.xlu1.b32.start.end [1/1] (short) (narrow) %v703_v1, 16  ;;  %v702_v2 = vld [vmem:[%s1048_s21 + $0x18] sm:$0xff]  ;;  %v704_v3 = vld [vmem:[%s1048_s21 + $0x28] sm:$0xff]  ;;  %v208_v11 = vld [vmem:[%s1048_s21] sm:$0xff]  ;;  %vm241_vm0 = vcmask 64512  }
  0x30   : > { %v244_v12 = vld [vmem:[%s1048_s21 + $0x8] sm:$0xff]  ;;  %vm321_vm1 = vcmask 130112   ;;  %vm409_vm2 = vcmask 195712   ;;  %s919_s28 = smov 96   ;;  %s920_s17 = smov 48   ;;  %vm456_vm3 = vcmask 191488  }
  0x31   : > { %s921_s20 = smov 24   ;;  %s922_s22 = smov 40   ;;  %vm464_vm4 = vcmask 388288   ;;  %v535_v35 = vld [vmem:[#allocation7 + $0x78] sm:$0xff]  ;;  %v534_v36 = vld [vmem:[#allocation7 + $0x70] sm:$0xff]  ;;  %v533_v37 = vld [vmem:[#allocation7 + $0x68] sm:$0xff] }
  0x32   : > { %s923_s24 = smov 120   ;;  %s924_s25 = smov 72   ;;  %556 = vmatpush.msra.mxu0 %v535_v35  ;;  %v532_v38 = vld [vmem:[#allocation7 + $0x60] sm:$0xff]  ;;  %v531_v39 = vld [vmem:[#allocation7 + $0x58] sm:$0xff]  ;;  %v530_v40 = vld [vmem:[#allocation7 + $0x50] sm:$0xff]  ;;  %vm472_vm5 = vcmask 585088  }
  0x33   : > { %v529_v41 = vld [vmem:[#allocation7 + $0x48] sm:$0xff]  ;;  %v528_v42 = vld [vmem:[#allocation7 + $0x40] sm:$0xff]  ;;  %v527_v43 = vld [vmem:[#allocation7 + $0x38] sm:$0xff]  ;;  %vm499_vm6 = vcmask 1044416   ;;  %vm500_vm7 = vcmask 130052   ;;  %vm480_vm8 = vcmask 781888  }
  0x34   : > { %557 = vmatpush.msra.mxu0 %v534_v36  ;;  %v543_v44 = vld [vmem:[#allocation7 + $0xb8] sm:$0xff]  ;;  %v542_v45 = vld [vmem:[#allocation7 + $0xb0] sm:$0xff]  ;;  %v541_v47 = vld [vmem:[#allocation7 + $0xa8] sm:$0xff]  ;;  %vm496_vm9 = vcmask 982016   ;;  %vm488_vm10 = vcmask 978688   ;;  %vm509_vm12 = vcmask 322688  }
  0x35   : > { %584 = vmatpush.msra.mxu1 %v543_v44  ;;  %v526_v46 = vld [vmem:[#allocation7 + $0x30] sm:$0xff]  ;;  %v525_v48 = vld [vmem:[#allocation7 + $0x28] sm:$0xff]  ;;  %v540_v49 = vld [vmem:[#allocation7 + $0xa0] sm:$0xff]  ;;  %vm517_vm13 = vcmask 519488   ;;  %vm553_vm14 = vcmask 523264   ;;  %s700_s29 = sshll.u32 %s1044_s8, 2 }
  0x36   : > { %558 = vmatpush.msra.mxu0 %v533_v37  ;;  %v524_v51 = vld [vmem:[#allocation7 + $0x20] sm:$0xff]  ;;  %v539_v52 = vld [vmem:[#allocation7 + $0x98] sm:$0xff]  ;;  %v538_v54 = vld [vmem:[#allocation7 + $0x90] sm:$0xff]  ;;  %s707_s30 = sshll.u32 %s966_s16, 2  ;;  %s207_s11 = scalar_lea.vmem [#allocation9], %s700_s29 }
  0x37   : > { %585 = vmatpush.msra.mxu1 %v542_v45  ;;  %v523_v53 = vld [vmem:[#allocation7 + $0x18] sm:$0xff]  ;;  %v522_v55 = vld [vmem:[#allocation7 + $0x10] sm:$0xff]  ;;  %v537_v56 = vld [vmem:[#allocation7 + $0x88] sm:$0xff]  ;;  %s608_s27 = scalar_lea.hbm %s1121_s3, %s707_s30  ;;  %s610_s21 = sshll.u32 %s207_s11, 4  ;;  %s611_s21 = int_to_ptr.vmem [resolvable:$true] %s610_s21 }
  0x38   : > { %559 = vmatpush.msra.mxu0 %v532_v38  ;;  %v521_v57 = vld [vmem:[#allocation7 + $0x8] sm:$0xff]  ;;  %v536_v58 = vld [vmem:[#allocation7 + $0x80] sm:$0xff]  ;;  %vm501_vm11 = vmor %vm500_vm7, %vm499_vm6  ;;  %s598_s16 = scalar_lea.sflag [#allocation6], %s1044_s8 }
  0x39   : > { %586 = vmatpush.msra.mxu1 %v541_v47  ;;  %v520_v60 = vld [vmem:[#allocation7] sm:$0xff] }
  0x3a   : > { %560 = vmatpush.msra.mxu0 %v531_v39 }
  0x3b   : > { %587 = vmatpush.msra.mxu1 %v540_v49 }
  0x3c   : > { %561 = vmatpush.msra.mxu0 %v530_v40 }
  0x3d   : > { %588 = vmatpush.msra.mxu1 %v539_v52 }
  0x3e   : > { %562 = vmatpush.msra.mxu0 %v529_v41 }
  0x3f   : > { %325 = vxpose.xlu0.b32.start.end [1/1] (short) (narrow) %v702_v2, 16  ;;  %413 = vxpose.xlu1.b32.start.end [1/1] (short) (narrow) %v704_v3, 16 }
  0x40   : > { %563 = vmatpush.msra.mxu0 %v528_v42  ;;  %589 = vmatpush.msra.mxu1 %v538_v54 }
  0x42   : > { %564 = vmatpush.msra.mxu0 %v527_v43  ;;  %590 = vmatpush.msra.mxu1 %v537_v56 }
  0x44   : > { %565 = vmatpush.msra.mxu0 %v526_v46  ;;  %591 = vmatpush.msra.mxu1 %v536_v58 }
  0x46   : > { %566 = vmatpush.msra.mxu0 %v525_v48 }
  0x48   : > { %567 = vmatpush.msra.mxu0 %v524_v51 }
  0x4a   : > { %568 = vmatpush.msra.mxu0 %v523_v53 }
  0x4c   : > { %569 = vmatpush.msra.mxu0 %v522_v55 }
  0x4e   : > { %570 = vmatpush.msra.mxu0 %v521_v57 }
  0x50   : > { %571 = vmatpush.msra.mxu0 %v520_v60 }
  0xd3   : > { %v297_v4 = vpop.trf.xlu0  ;;  %v385_v5 = vpop.trf.xlu1 }
  0xd4   : > { %315 = vrot.lane.b32.xlu2 %v297_v4, %s917_s18  ;;  %403 = vrot.lane.b32.xlu1 %v385_v5, %s918_s23 }
  0xdb   : > { %v298_v6 = vpop.trf.xlu0  ;;  %v386_v8 = vpop.trf.xlu1 }
  0xe3   : > { %v341_v7 = vpop.trf.xlu0  ;;  %v429_v9 = vpop.trf.xlu1 }
  0xe4   : > { %359 = vrot.lane.b32.xlu2 %v341_v7, %s917_s18 }
  0xeb   : > { %v430_v10 = vpop.trf.xlu1  ;;  %v342_v13 = vpop.trf.xlu0 }
  0xec   : > { %317 = vrot.lane.b32.xlu2 %v298_v6, %s917_s18  ;;  %361 = vrot.lane.b32.xlu0 %v342_v13, %s917_s18  ;;  %v781_v6 = vld [vmem:[%s1120_s2] ss:$0 sm:$0xff]  ;;  %s612_s18 = sshll.u32 %s608_s27, 4  ;;  %s613_s18 = int_to_ptr.hbm [resolvable:$true] %s612_s18 }
  0xf4   : > { %447 = vrot.lane.b32.xlu2 %v429_v9, %s918_s23 }
  0xfc   : > { %405 = vrot.lane.b32.xlu2 %v386_v8, %s918_s23 }
 0x104   : > { %449 = vrot.lane.b32.xlu2 %v430_v10, %s918_s23 }
 0x12a   : > { %209 = vxpose.xlu2.b32.start.end [1/1] (short) (narrow) %v208_v11, 16 }
 0x12e   : > { %v316_v14 = vpop.permute.xlu2 %315 }
 0x13a   : > { %245 = vxpose.xlu2.b32.start.end [1/1] (short) (narrow) %v244_v12, 16 }
 0x13e   : > { %v360_v15 = vpop.permute.xlu2 %359 }
 0x146   : > { %v318_v16 = vpop.permute.xlu2 %317  ;;  %v404_v21 = vpop.permute.xlu1 %403 }
 0x14e   : > { %v448_v17 = vpop.permute.xlu2 %447 }
 0x156   : > { %v406_v18 = vpop.permute.xlu2 %405 }
 0x15e   : > { %v450_v19 = vpop.permute.xlu2 %449  ;;  %v362_v24 = vpop.permute.xlu0 %361 }
 0x1c3   : > { %v225_v20 = vpop.trf.xlu2 }
 0x1c4   : > { %242 = vst.msk [vmem:[#allocation2] sm:$0xff] %vm241_vm0, %v225_v20 }
 0x1c5   : > { %322 = vst.msk [vmem:[#allocation2] sm:$0xff] %vm321_vm1, %v316_v14 }
 0x1c6   : > { %410 = vst.msk [vmem:[#allocation2] sm:$0xff] %vm409_vm2, %v404_v21 }
 0x1cb   : > { %v226_v22 = vpop.trf.xlu2 }
 0x1cc   : > { %243 = vst.msk [vmem:[#allocation2 + $0x8] sm:$0xff] %vm241_vm0, %v226_v22 }
 0x1cd   : > { %323 = vst.msk [vmem:[#allocation2 + $0x8] sm:$0xff] %vm321_vm1, %v318_v16 }
 0x1ce   : > { %411 = vst.msk [vmem:[#allocation2 + $0x8] sm:$0xff] %vm409_vm2, %v406_v18 }
 0x1d3   : > { %v261_v23 = vpop.trf.xlu2 }
 0x1d4   : > { %277 = vst.msk [vmem:[#allocation2 + $0x10] sm:$0xff] %vm241_vm0, %v261_v23 }
 0x1d5   : > { %365 = vst.msk [vmem:[#allocation2 + $0x10] sm:$0xff] %vm321_vm1, %v360_v15 }
 0x1d6   : > { %453 = vst.msk [vmem:[#allocation2 + $0x10] sm:$0xff] %vm409_vm2, %v448_v17 }
 0x1db   : > { %v262_v25 = vpop.trf.xlu2 }
 0x1dc   : > { %278 = vst.msk [vmem:[#allocation2 + $0x18] sm:$0xff] %vm241_vm0, %v262_v25 }
 0x1dd   : > { %366 = vst.msk [vmem:[#allocation2 + $0x18] sm:$0xff] %vm321_vm1, %v362_v24 }
 0x1de   : > { %454 = vst.msk [vmem:[#allocation2 + $0x18] sm:$0xff] %vm409_vm2, %v450_v19 }
 0x1e5   : > { %v483_v26 = vld [vmem:[#allocation2 + $0x4] ss:$8 sm:$0xf]  ;;  %v467_v27 = vld [vmem:[#allocation2 + $0x2] ss:$8 sm:$0xf] }
 0x1e6   : > { %485 = vrot.lane.b32.xlu0 %v483_v26, %s919_s28  ;;  %469 = vrot.lane.b32.xlu1 %v467_v27, %s920_s17  ;;  %v459_v28 = vld [vmem:[#allocation2 + $0x1] ss:$8 sm:$0xf]  ;;  %v455_v29 = vld [vmem:[#allocation2] ss:$8 sm:$0xf] }
 0x1e7   : > { %461 = vrot.lane.b32.xlu2 %v459_v28, %s921_s20  ;;  %457 = vst.msk [vmem:[#allocation3] sm:$0xf] %vm456_vm3, %v455_v29  ;;  %v512_v30 = vld [vmem:[#allocation2 + $0x7] ss:$8 sm:$0xf] }
 0x1e8   : > { %v491_v31 = vld [vmem:[#allocation2 + $0x5] ss:$8 sm:$0xf]  ;;  %v475_v32 = vld [vmem:[#allocation2 + $0x3] ss:$8 sm:$0xf] }
 0x1e9   : > { %v504_v33 = vld [vmem:[#allocation2 + $0x6] ss:$8 sm:$0xf] }
 0x1ee   : > { %514 = vrot.lane.b32.xlu0 %v512_v30, %s922_s22  ;;  %493 = vrot.lane.b32.xlu1 %v491_v31, %s923_s24  ;;  %s862_s22 = scalar_lea.hbm %s1121_s3, 8 }
 0x1f6   : > { %477 = vrot.lane.b32.xlu1 %v475_v32, %s924_s25 }
 0x1fe   : > { %506 = vrot.lane.b32.xlu1 %v504_v33, %s918_s23  ;;  %s856_s23 = sshra.s32 %s613_s18, 4  ;;  %s857_s23 = int_to_ptr.hbm [resolvable:$true] %s856_s23 }
 0x1ff   : > { %s858_s28 = scalar_lea.hbm %s857_s23, 4  ;;  %p863_p11 = scmp.lt.s32.totalorder %s857_s23, %s1121_s3 }
 0x200   : > { %p859_p1 = scmp.ne.s32.totalorder %s857_s23, %s858_s28  ;;  %p864_p9 = scmp.lt.s32.totalorder %s862_s22, %s858_s28 }
 0x202   : > { %p860_p4 = pnand %p859_p1, %p1015_p7  ;;  %p865_p2 = por %p864_p9, %p863_p11 }
 0x204   : > { %p861_p8 = pneg %p860_p4 }
 0x206   : > { %p866_p10 = pnand %p865_p2, %p861_p8 }
 0x241   : > { %v462_v34 = vpop.permute.xlu2 %461 }
 0x242   : > { %465 = vst.msk [vmem:[#allocation3] sm:$0xf] %vm464_vm4, %v462_v34 }
 0x258   : > { %v470_v50 = vpop.permute.xlu1 %469  ;;  %v486_v62 = vpop.permute.xlu0 %485 }
 0x259   : > { %473 = vst.msk [vmem:[#allocation3] sm:$0xf] %vm472_vm5, %v470_v50 }
 0x260   : > { %v494_v59 = vpop.permute.xlu1 %493  ;;  %v515_v2 = vpop.permute.xlu0 %514 }
 0x261   : > { %v495_v61 = vrot.slane %v494_v59, 4 }
 0x263   : > { %v497_v0 = vsel %vm496_vm9, %v495_v61, %v494_v59 }
 0x268   : > { %v478_v63 = vpop.permute.xlu1 %477 }
 0x269   : > { %481 = vst.msk [vmem:[#allocation3] sm:$0xf] %vm480_vm8, %v478_v63 }
 0x26a   : > { %489 = vst.msk [vmem:[#allocation3] sm:$0xf] %vm488_vm10, %v486_v62 }
 0x26b   : > { %502 = vst.msk [vmem:[#allocation3] sm:$0xff] %vm501_vm11, %v497_v0 }
 0x270   : > { %v507_v1 = vpop.permute.xlu1 %506 }
 0x271   : > { %510 = vst.msk [vmem:[#allocation3 + $0x4] sm:$0xf] %vm509_vm12, %v507_v1 }
 0x272   : > { %518 = vst.msk [vmem:[#allocation3 + $0x4] sm:$0xf] %vm517_vm13, %v515_v2 }
 0x279   : > { %v519_v3 = vld [vmem:[#allocation3] sm:$0xff] }
 0x27a   : > { %549 = vst [vmem:[#allocation1] ss:$2 sm:$0xff] %v519_v3 }
 0x281   : > { %v550_v4 = vld.sshfl [vmem:[#allocation1] sm:$0xff pattern:$0x75316420]  ;;  %v551_v5 = vld.sshfl [vmem:[#allocation1 + $0x8] sm:$0xff pattern:$0x75316420] }
 0x282   : > { %572 = vmatmul.f32.vlgmr.msra.gmra.mxu0 %v550_v4  ;;  %705 = vmatmul.msk.f32.vlgmr.msra.gmra.mxu1 %vm553_vm14, %v551_v5 }
 0x2ff   : > { %v573_v7 = vpop.f32.mrf.mxu0  ;;  %v593_v9 = vpop.f32.mrf.mxu1 }
 0x300   : > { %v574_v8 = vadd.f32 %v781_v6, %v573_v7 }
 0x302   : > { %v594_v10 = vadd.f32 %v593_v9, %v574_v8 }
 0x304   : > { %596 = vst [vmem:[%s207_s11] sm:$0xf] %v594_v10 }
 0x305   : > { %869 = shalt.err (!%p866_p10)
}
 0x306   : > { %719 = dma.vmem_to_hbm [thread:$0]  (%p1015_p7), %s611_s21, 64, %s613_s18, %s598_s16  }
 0x307 PF: > { %s624_s8 = sand.u32 1, %s900_s12   ;;  %p1129_p12 = scmp.ge.s32.totalorder %s912_s15, 2 }
 0x308   : > { %s625_s29 = scalar_lea.sflag [#allocation6], %s624_s8 }
 0x309   : > { %p730_p13 = pnand %p1129_p12, %p980_p6 }
 0x30b   : > { %p731_p0 = pneg %p730_p13 }
 0x30d   : > { %895 = dma.done.wait (%p731_p0), %s625_s29, 64  }
 0x30e   : > { %897 = vsyncadd (%p731_p0), %s625_s29, 4294967232  ;;  %p17_p3 = scmp.ge.s32.totalorder %s998_s26, 4   ;;  %s1130_s12 = smov %s904_s13 }
 0x30f   : > { %s1131_s13 = smov %s908_s14  ;;  %s1132_s14 = smov %s1011_s4 }
 0x310   : > { %s1133_s15 = smov %s998_s26  ;;  %19 = sbr.rel (!%p17_p3) target bundleno = 6 (0x6), region = 90 }
 0x315   :  { %631 = vsyncpa [#allocation5], 1 }
 0x316   :  { %633 = vsyncpa [#allocation5 + $0x1], 1 }
 0x317   :  { %634 = vsyncpa [#allocation8], 1 }
 0x318   :  { %635 = vsyncpa [#allocation6], 1 }
 0x319   :  { %637 = vsyncpa [#allocation6 + $0x1], 1 }

</bundles_post_ra>
